<compile_context>
chip_gen: v6e
topology: v6e:2x2x1
jax: 0.10.0
libtpu: 0.0.40
codegen_flags: <defaults>
</compile_context>

<pallas_src>
import functools

import jax
import jax.numpy as jnp
from jax.experimental import pallas as pl
from jax.experimental.pallas import tpu as pltpu

LANES = 128          # lane width of the flattened (rows, 128) slab
_SUB = 8             # f32 sublanes per vreg (accumulator shape)
_CHUNK_ROWS = 512    # in-kernel compute chunk: 512*128*4B = 256 KiB f32 temporaries
_FALLBACK_ELEMS = 64 * 1024   # below this, let XLA fuse the reduction
_MIB = 1024 * 1024


def _round_up(x, m):
    return ((x + m - 1) // m) * m


def _device_kind():
    try:
        return jax.devices()[0].device_kind.lower()
    except Exception:
        return ""


def _sse_kernel(p_ref, t_ref, o_ref, acc_ref, *, block_rows, chunk_rows,
                blocks_per_core, rows_valid):
    """Per-core partial sum of (pred - target)^2 over this core's row range."""
    c = pl.program_id(0)   # TensorCore split axis ("parallel")
    j = pl.program_id(1)   # reduction axis ("arbitrary")

    @pl.when(j == 0)
    def _init():
        acc_ref[...] = jnp.zeros_like(acc_ref)

    logical_blk = c * blocks_per_core + j
    row0 = logical_blk * block_rows
    num_chunks = block_rows // chunk_rows

    def _partial(masked):
        # Hoisted once per branch (broadcast_in_dim is not CSE'd by JAX).
        if masked:
            local_rows = jax.lax.broadcasted_iota(
                jnp.int32, (chunk_rows, LANES), 0)

        def body(i, carry):
            r0 = pl.multiple_of(i * chunk_rows, chunk_rows)
            d = (p_ref[pl.ds(r0, chunk_rows), :].astype(jnp.float32)
                 - t_ref[pl.ds(r0, chunk_rows), :].astype(jnp.float32))
            sq = d * d
            if masked:
                # Zero rows past the valid range (boundary block / phantom
                # core-split block): select, so garbage never reaches the sum.
                gid = row0 + i * chunk_rows + local_rows
                sq = jnp.where(gid < rows_valid, sq, 0.0)
            return carry + jnp.sum(sq.reshape(-1, _SUB, LANES), axis=0)

        return jax.lax.fori_loop(0, num_chunks, body,
                                 jnp.zeros((_SUB, LANES), jnp.float32))

    full = row0 + block_rows <= rows_valid   # whole block in-range?

    # Hot path: no masking work for fully in-range blocks (pure VPU adds).
    @pl.when(full)
    def _acc_full():
        acc_ref[...] += _partial(masked=False)

    @pl.when(jnp.logical_not(full))
    def _acc_masked():
        acc_ref[...] += _partial(masked=True)

    # Only the final step does the cross-lane reduce + scalar SMEM store.
    @pl.when(j == pl.num_programs(1) - 1)
    def _finalize():
        o_ref[0, 0] = jnp.sum(acc_ref[...])


def mse_loss_pallas(pred, target):
    """F.mse_loss(pred, target) with default 'mean' reduction, Pallas-backed."""
    assert pred.shape == target.shape, "pred/target shapes must match"
    n_elems = pred.size

    # Small inputs: kernel launch + grid overhead cannot win; let XLA fuse it.
    if n_elems < _FALLBACK_ELEMS:
        d = pred.astype(jnp.float32) - target.astype(jnp.float32)
        return jnp.mean(d * d)

    p = pred.reshape(-1)
    t = target.reshape(-1)

    # Ragged tail (< 128 elements) handled in plain JAX so the (rows, 128)
    # reshape of the main part is a free bitcast (no jnp.pad full-array copy
    # for numel % 128 == 0, which is the common case).
    main = (n_elems // LANES) * LANES
    tail_sse = jnp.float32(0.0)
    if main != n_elems:
        # TODO(synk): for numel % 128 != 0 the slice of the main part still
        # materializes ~N elements in HBM; a fully copy-free path needs a 1-D
        # flat-index-masked kernel.
        tp = p[main:].astype(jnp.float32)
        tt = t[main:].astype(jnp.float32)
        tail_sse = jnp.sum((tp - tt) ** 2)
        p = p[:main]
        t = t[:main]
    rows = main // LANES

    kind = _device_kind()
    is_v7 = "7" in kind                                  # v7x: 2 TCs, ~3.2 TB/s/TC
    multi_tc = is_v7 or ("v4" in kind) or ("v5p" in kind)
    core_split = 2 if multi_tc else 1

    # DMA block: ~4 MiB/input/buffer on v7x, ~2 MiB elsewhere, dtype-aware and a
    # multiple of the 512-row compute chunk (hence of 8/16/32 packed tiling).
    itemsize = pred.dtype.itemsize
    target_bytes = (4 if is_v7 else 2) * _MIB
    block_rows_max = max(
        _CHUNK_ROWS,
        (target_bytes // (LANES * itemsize)) // _CHUNK_ROWS * _CHUNK_ROWS)
    block_rows = min(block_rows_max, _round_up(rows, _CHUNK_ROWS))
    num_blocks = pl.cdiv(rows, block_rows)
    blocks_per_core = pl.cdiv(num_blocks, core_split)
    grid = (core_split, blocks_per_core)

    p2 = p.reshape(rows, LANES)
    t2 = t.reshape(rows, LANES)

    def in_index_map(c, j):
        # Clamp so a phantom block (odd num_blocks with 2-way split) DMAs valid
        # memory; its contribution is zeroed by the in-kernel row mask.
        return (jnp.minimum(c * blocks_per_core + j, num_blocks - 1), 0)

    kernel = functools.partial(
        _sse_kernel,
        block_rows=block_rows,
        chunk_rows=_CHUNK_ROWS,
        blocks_per_core=blocks_per_core,
        rows_valid=rows,
    )

    compiler_kwargs = dict(dimension_semantics=("parallel", "arbitrary"))
    if is_v7:
        # 2 inputs x 2 buffers x 4 MiB = 16 MiB of pipeline buffers (+ ~1 MiB of
        # chunk temporaries) — give the kernel headroom under v7x's 64 MiB VMEM.
        compiler_kwargs["vmem_limit_bytes"] = 28 * _MIB

    cost = pl.CostEstimate(
        flops=3 * main,
        transcendentals=0,
        bytes_accessed=2 * main * itemsize + core_split * 4,
    )

    partials = pl.pallas_call(
        kernel,
        out_shape=jax.ShapeDtypeStruct((core_split, 1), jnp.float32),
        grid_spec=pltpu.PrefetchScalarGridSpec(
            num_scalar_prefetch=0,
            grid=grid,
            in_specs=[
                pl.BlockSpec((block_rows, LANES), in_index_map),
                pl.BlockSpec((block_rows, LANES), in_index_map),
            ],
            out_specs=pl.BlockSpec(
                (1, 1), lambda c, j: (c, 0), memory_space=pltpu.SMEM),
            scratch_shapes=[pltpu.VMEM((_SUB, LANES), jnp.float32)],
        ),
        compiler_params=pltpu.CompilerParams(**compiler_kwargs),
        cost_estimate=cost,
    )(p2, t2)

    sse = jnp.sum(partials) + tail_sse
    return (sse / jnp.float32(n_elems)).astype(jnp.float32)


class GenericLossLayer:
    """JAX mirror of the PyTorch GenericLossLayer: forward = func_handle(pred, target)."""

    def __init__(self, func_handle):
        self.func = func_handle

    def __call__(self, pred, target):
        return self.func(pred, target)


if __name__ == "__main__":
    key = jax.random.PRNGKey(0)
    layer = GenericLossLayer(mse_loss_pallas)

    cases = [
        # (name, shape, dtype)
        ("small NCHW -> fused-XLA fallback", (2, 4, 16, 16), jnp.float32),
        ("kernel path, full blocks", (4, 8, 64, 128), jnp.float32),
        ("kernel path, multi-block reduction", (2, 16, 128, 256), jnp.float32),
        ("kernel path, ragged boundary block", (3, 257, 128), jnp.float32),
        ("kernel path, unaligned numel + JAX tail", (5, 41, 333), jnp.float32),
        ("kernel path, bf16 inputs", (2, 16, 128, 256), jnp.bfloat16),
    ]

    for name, shape, dtype in cases:
        key, k1, k2 = jax.random.split(key, 3)
        pred = jax.random.normal(k1, shape, dtype=dtype)
        target = jax.random.normal(k2, shape, dtype=dtype)

        loss = jax.block_until_ready(layer(pred, target))

        ref = jnp.mean(
            (pred.astype(jnp.float32) - target.astype(jnp.float32)) ** 2)
        assert jnp.allclose(loss, ref, rtol=1e-5, atol=1e-5), (name, loss, ref)

    print("KERNEL_OK")
</pallas_src>

<mosaic_0001>
module attributes {stable_mosaic.version = 11 : i64} {
  func.func @_sse_kernel(%arg0: i32, %arg1: i32, %arg2: memref<2048x128xf32, #tpu.memory_space<vmem>>, %arg3: memref<2048x128xf32, #tpu.memory_space<vmem>>, %arg4: memref<1x1xf32, #tpu.memory_space<smem>>, %arg5: memref<8x128xf32, #tpu.memory_space<vmem>>) attributes {dimension_semantics = [#tpu.dimension_semantics<parallel>, #tpu.dimension_semantics<arbitrary>], iteration_bounds = array<i64: 1, 1>, scalar_prefetch = 0 : i64, scratch_operands = 1 : i64, tpu.core_type = #tpu.core_type<tc>, window_params = [{transform_indices = @transform_0, window_bounds = array<i64: 2048, 128>}, {transform_indices = @transform_1, window_bounds = array<i64: 2048, 128>}, {transform_indices = @transform_2, window_bounds = array<i64: 1, 1>}]} {
    %c0_i32 = arith.constant 0 : i32
    %0 = arith.cmpi eq, %arg1, %c0_i32 : i32
    %1 = arith.extui %0 : i1 to i32
    %c0_i32_0 = arith.constant 0 : i32
    %2 = arith.cmpi ne, %1, %c0_i32_0 : i32
    scf.if %2 {
      %cst = arith.constant 0.000000e+00 : f32
      %16 = vector.broadcast %cst : f32 to vector<8x128xf32>
      %c0 = arith.constant 0 : index
      %c0_7 = arith.constant 0 : index
      %17 = vector.load %arg5[%c0, %c0_7] : memref<8x128xf32, #tpu.memory_space<vmem>>, vector<8x128xf32>
      tpu.vector_store %arg5[%c0, %c0_7], %16 {strides = array<i32>} : memref<8x128xf32, #tpu.memory_space<vmem>>, vector<8x128xf32>,
    } else {
    }
    %c1_i32 = arith.constant 1 : i32
    %3 = arith.muli %arg0, %c1_i32 : i32
    %4 = arith.addi %3, %arg1 : i32
    %c2048_i32 = arith.constant 2048 : i32
    %5 = arith.muli %4, %c2048_i32 : i32
    %c2048_i32_1 = arith.constant 2048 : i32
    %6 = arith.addi %5, %c2048_i32_1 : i32
    %c2048_i32_2 = arith.constant 2048 : i32
    %7 = arith.cmpi sle, %6, %c2048_i32_2 : i32
    %8 = arith.extui %7 : i1 to i32
    %c0_i32_3 = arith.constant 0 : i32
    %9 = arith.cmpi ne, %8, %c0_i32_3 : i32
    scf.if %9 {
      %c0 = arith.constant 0 : index
      %c0_7 = arith.constant 0 : index
      %16 = vector.load %arg5[%c0, %c0_7] : memref<8x128xf32, #tpu.memory_space<vmem>>, vector<8x128xf32>
      %cst = arith.constant 0.000000e+00 : f32
      %17 = vector.broadcast %cst : f32 to vector<8x128xf32>
      %c0_i32_8 = arith.constant 0 : i32
      %c4_i32 = arith.constant 4 : i32
      %18 = arith.addi %c0_i32_8, %c4_i32 : i32
      %c1_i32_9 = arith.constant 1 : i32
      %19 = scf.for %arg6 = %c0_i32_8 to %18 step %c1_i32_9 iter_args(%arg7 = %17) -> (vector<8x128xf32>)  : i32 {
        %c512_i32 = arith.constant 512 : i32
        %22 = arith.muli %arg6, %c512_i32 : i32
        %23 = tpu.assume_multiple %22, 512 : i32
        %24 = arith.index_cast %23 : i32 to index
        %c0_13 = arith.constant 0 : index
        %25 = vector.load %arg2[%24, %c0_13] : memref<2048x128xf32, #tpu.memory_space<vmem>>, vector<512x128xf32>
        %26 = arith.index_cast %23 : i32 to index
        %c0_14 = arith.constant 0 : index
        %27 = vector.load %arg3[%26, %c0_14] : memref<2048x128xf32, #tpu.memory_space<vmem>>, vector<512x128xf32>
        %28 = arith.subf %25, %27 : vector<512x128xf32>
        %29 = arith.mulf %28, %28 : vector<512x128xf32>
        %30 = vector.shape_cast %29 : vector<512x128xf32> to vector<64x8x128xf32>
        %cst_15 = arith.constant dense<0.000000e+00> : vector<8x128xf32>
        %31 = vector.multi_reduction <add>, %30, %cst_15 [0] : vector<64x8x128xf32> to vector<8x128xf32>
        %32 = arith.addf %arg7, %31 : vector<8x128xf32>
        scf.yield %32 : vector<8x128xf32>
      }
      %c4_i32_10 = arith.constant 4 : i32
      %20 = arith.addf %16, %19 : vector<8x128xf32>
      %c0_11 = arith.constant 0 : index
      %c0_12 = arith.constant 0 : index
      %21 = vector.load %arg5[%c0_11, %c0_12] : memref<8x128xf32, #tpu.memory_space<vmem>>, vector<8x128xf32>
      tpu.vector_store %arg5[%c0_11, %c0_12], %20 {strides = array<i32>} : memref<8x128xf32, #tpu.memory_space<vmem>>, vector<8x128xf32>,
    } else {
    }
    %true = arith.constant true
    %10 = arith.xori %7, %true : i1
    %11 = arith.extui %10 : i1 to i32
    %c0_i32_4 = arith.constant 0 : i32
    %12 = arith.cmpi ne, %11, %c0_i32_4 : i32
    scf.if %12 {
      %c0 = arith.constant 0 : index
      %c0_7 = arith.constant 0 : index
      %16 = vector.load %arg5[%c0, %c0_7] : memref<8x128xf32, #tpu.memory_space<vmem>>, vector<8x128xf32>
      %17 = tpu.iota {dimensions = array<i32: 0>} : vector<512x128xi32>
      %cst = arith.constant 0.000000e+00 : f32
      %18 = vector.broadcast %cst : f32 to vector<8x128xf32>
      %c0_i32_8 = arith.constant 0 : i32
      %c4_i32 = arith.constant 4 : i32
      %19 = arith.addi %c0_i32_8, %c4_i32 : i32
      %c1_i32_9 = arith.constant 1 : i32
      %20 = scf.for %arg6 = %c0_i32_8 to %19 step %c1_i32_9 iter_args(%arg7 = %18) -> (vector<8x128xf32>)  : i32 {
        %c512_i32 = arith.constant 512 : i32
        %23 = arith.muli %arg6, %c512_i32 : i32
        %24 = tpu.assume_multiple %23, 512 : i32
        %25 = arith.index_cast %24 : i32 to index
        %c0_13 = arith.constant 0 : index
        %26 = vector.load %arg2[%25, %c0_13] : memref<2048x128xf32, #tpu.memory_space<vmem>>, vector<512x128xf32>
        %27 = arith.index_cast %24 : i32 to index
        %c0_14 = arith.constant 0 : index
        %28 = vector.load %arg3[%27, %c0_14] : memref<2048x128xf32, #tpu.memory_space<vmem>>, vector<512x128xf32>
        %29 = arith.subf %26, %28 : vector<512x128xf32>
        %30 = arith.mulf %29, %29 : vector<512x128xf32>
        %c512_i32_15 = arith.constant 512 : i32
        %31 = arith.muli %arg6, %c512_i32_15 : i32
        %32 = arith.addi %5, %31 : i32
        %33 = vector.broadcast %32 : i32 to vector<512x128xi32>
        %34 = arith.addi %33, %17 : vector<512x128xi32>
        %c2048_i32_16 = arith.constant 2048 : i32
        %35 = vector.broadcast %c2048_i32_16 : i32 to vector<512x128xi32>
        %36 = arith.cmpi slt, %34, %35 : vector<512x128xi32>
        %cst_17 = arith.constant 0.000000e+00 : f32
        %37 = vector.broadcast %cst_17 : f32 to vector<512x128xf32>
        %38 = arith.select %36, %30, %37 : vector<512x128xi1>, vector<512x128xf32>
        %39 = vector.shape_cast %38 : vector<512x128xf32> to vector<64x8x128xf32>
        %cst_18 = arith.constant dense<0.000000e+00> : vector<8x128xf32>
        %40 = vector.multi_reduction <add>, %39, %cst_18 [0] : vector<64x8x128xf32> to vector<8x128xf32>
        %41 = arith.addf %arg7, %40 : vector<8x128xf32>
        scf.yield %41 : vector<8x128xf32>
      }
      %c4_i32_10 = arith.constant 4 : i32
      %21 = arith.addf %16, %20 : vector<8x128xf32>
      %c0_11 = arith.constant 0 : index
      %c0_12 = arith.constant 0 : index
      %22 = vector.load %arg5[%c0_11, %c0_12] : memref<8x128xf32, #tpu.memory_space<vmem>>, vector<8x128xf32>
      tpu.vector_store %arg5[%c0_11, %c0_12], %21 {strides = array<i32>} : memref<8x128xf32, #tpu.memory_space<vmem>>, vector<8x128xf32>,
    } else {
    }
    %c0_i32_5 = arith.constant 0 : i32
    %13 = arith.cmpi eq, %arg1, %c0_i32_5 : i32
    %14 = arith.extui %13 : i1 to i32
    %c0_i32_6 = arith.constant 0 : i32
    %15 = arith.cmpi ne, %14, %c0_i32_6 : i32
    scf.if %15 {
      %c0 = arith.constant 0 : index
      %c0_7 = arith.constant 0 : index
      %16 = vector.load %arg5[%c0, %c0_7] : memref<8x128xf32, #tpu.memory_space<vmem>>, vector<8x128xf32>
      %17 = vector.shape_cast %16 : vector<8x128xf32> to vector<1x8x128xf32>
      %cst = arith.constant dense<0.000000e+00> : vector<1xf32>
      %18 = vector.multi_reduction <add>, %17, %cst [1, 2] : vector<1x8x128xf32> to vector<1xf32>
      %19 = vector.shape_cast %18 : vector<1xf32> to vector<1x1x1xf32>
      %20 = vector.extract %19[0, 0, 0] : f32 from vector<1x1x1xf32>
      %c0_8 = arith.constant 0 : index
      %c0_9 = arith.constant 0 : index
      %21 = memref.load %arg4[%c0_8, %c0_9] : memref<1x1xf32, #tpu.memory_space<smem>>
      memref.store %20, %arg4[%c0_8, %c0_9] : memref<1x1xf32, #tpu.memory_space<smem>>
    } else {
    }
    return
  }
  func.func @transform_0(%arg0: i32, %arg1: i32) -> (i32, i32) {
    %c1_i32 = arith.constant 1 : i32
    %0 = arith.muli %arg0, %c1_i32 : i32
    %1 = arith.addi %0, %arg1 : i32
    %c0_i32 = arith.constant 0 : i32
    %2 = arith.minsi %1, %c0_i32 : i32
    %c0_i32_0 = arith.constant 0 : i32
    %c0_i32_1 = arith.constant 0 : i32
    return %2, %c0_i32_0 : i32, i32
  }
  func.func @transform_1(%arg0: i32, %arg1: i32) -> (i32, i32) {
    %c1_i32 = arith.constant 1 : i32
    %0 = arith.muli %arg0, %c1_i32 : i32
    %1 = arith.addi %0, %arg1 : i32
    %c0_i32 = arith.constant 0 : i32
    %2 = arith.minsi %1, %c0_i32 : i32
    %c0_i32_0 = arith.constant 0 : i32
    %c0_i32_1 = arith.constant 0 : i32
    return %2, %c0_i32_0 : i32, i32
  }
  func.func @transform_2(%arg0: i32, %arg1: i32) -> (i32, i32) {
    %c0_i32 = arith.constant 0 : i32
    %c0_i32_0 = arith.constant 0 : i32
    return %arg0, %c0_i32 : i32, i32
  }
}

</mosaic_0001>

<bundles_post_ra>
// kernel: tpu_custom_call.1
= control target key start
LH: loop header
LB: loop body
LE: loop exit
PB: predicated region body
PF: predicated region fallthrough
CT: control target
= control target key end

     0   :  { %7 = vsyncpa [#allocation4], 0  ;;  %s1457_s0 = inlined_call_operand.hbm [shape: f32[2048,128], index: 0, kind: input, shape index: {}]   ;;  %s1458_s1 = inlined_call_operand.hbm [shape: f32[2048,128], index: 1, kind: input, shape index: {}]   ;;  %s1459_s2 = inlined_call_operand.hbm [shape: f32[1,1], index: 2, kind: output, shape index: {}]  }
   0x1   :  { %8 = vsyncpa [#allocation7], 0 }
   0x2   :  { %9 = vsyncpa [#allocation5], 0  ;;  %s1155_s9 = smov [#allocation3]  }
   0x3   :  { %s21_s10 = sshll.u32 %s1155_s9, 4  ;;  %s22_s10 = int_to_ptr.vmem [resolvable:$true] %s21_s10 }
   0x4   :  { %s1093_s11 = scalar_lea.vmem %s22_s10, 32768  ;;  %p1098_p1 = scmp.lt.s32.totalorder %s22_s10, %s22_s10 }
   0x5   :  { %p1094_p0 = scmp.ne.s32.totalorder %s22_s10, %s1093_s11  ;;  %p1099_p2 = scmp.lt.s32.totalorder %s1093_s11, %s1093_s11 }
   0x7   :  { %p1100_p3 = por %p1099_p2, %p1098_p1 }
   0x9   :  { %p1101_p4 = pnand %p1100_p3, %p1094_p0 }
   0xb   :  { %1104 = shalt.err (!%p1101_p4)
}
   0xc   :  { %s1156_s12 = smov 128   ;;  %s1157_s13 = smov 8  }
   0xd   :  { %27 = dma.hbm_to_vmem [thread:$0]  %s1457_s0, 32768, %s22_s10, [#allocation4], %s1156_s12, %s1156_s12, %s1157_s13  }
   0xe   :  { %s1158_s16 = smov [#allocation6]  }
   0xf   :  { %s39_s17 = sshll.u32 %s1158_s16, 4  ;;  %s40_s17 = int_to_ptr.vmem [resolvable:$true] %s39_s17 }
  0x10   :  { %s1113_s18 = scalar_lea.vmem %s40_s17, 32768  ;;  %p1118_p6 = scmp.lt.s32.totalorder %s40_s17, %s40_s17 }
  0x11   :  { %p1114_p5 = scmp.ne.s32.totalorder %s40_s17, %s1113_s18  ;;  %p1119_p7 = scmp.lt.s32.totalorder %s1113_s18, %s1113_s18 }
  0x13   :  { %p1120_p8 = por %p1119_p7, %p1118_p6 }
  0x15   :  { %p1121_p9 = pnand %p1120_p8, %p1114_p5 }
  0x17   :  { %1124 = shalt.err (!%p1121_p9)
}
  0x18   :  { %45 = dma.hbm_to_vmem [thread:$0]  %s1458_s1, 32768, %s40_s17, [#allocation7], %s1156_s12, %s1156_s12, %s1157_s13  }
  0x19   :  { %1141 = dma.done.wait [#allocation4], 32768  }
  0x1a   :  { %1142 = vsyncadd [#allocation4], 4294934528 }
  0x1b   :  { %1143 = dma.done.wait [#allocation7], 32768  }
  0x1c   :  { %1144 = vsyncadd [#allocation7], 4294934528  ;;  %v1181_v0 = vmov 0.0   ;;  %s1183_s0 = smov 0  }
  0x1d LB: > { %s1059_s21 = sshll.u32 %s1153_s0, 9  ;;  %s78_s0 = sadd.s32 1, %s1153_s0   ;;  %s1153_s0 = sphi %s1183_s0, %s78_s0   ;;  %v1149_v0 = vphi %v1181_v0, %v1460_v0  }
  0x1e   : > { %s1192_s22 = scalar_lea.vmem [#allocation3], %s1059_s21  ;;  %s1208_s1 = scalar_lea.vmem [#allocation6], %s1059_s21 }
  0x1f   : > { %v115_v1 = vld [vmem:[%s1192_s22 + $0x108] sm:$0xff]  ;;  %v116_v2 = vld [vmem:[%s1192_s22 + $0x110] sm:$0xff]  ;;  %v117_v3 = vld [vmem:[%s1192_s22 + $0x118] sm:$0xff]  ;;  %p75_p10 = scmp.ge.s32.totalorder %s78_s0, 4  }
  0x20   : > { %v118_v4 = vld [vmem:[%s1192_s22 + $0x120] sm:$0xff]  ;;  %v119_v5 = vld [vmem:[%s1192_s22 + $0x128] sm:$0xff]  ;;  %v120_v6 = vld [vmem:[%s1192_s22 + $0x130] sm:$0xff]  ;;  %s1159_s24 = smov (%p75_p10), [#allocation8]  }
  0x21   : > { %v121_v7 = vld [vmem:[%s1192_s22 + $0x138] sm:$0xff]  ;;  %v122_v8 = vld [vmem:[%s1192_s22 + $0x140] sm:$0xff]  ;;  %v123_v9 = vld [vmem:[%s1192_s22 + $0x148] sm:$0xff] }
  0x22   : > { %v124_v10 = vld [vmem:[%s1192_s22 + $0x150] sm:$0xff]  ;;  %v125_v11 = vld [vmem:[%s1192_s22 + $0x158] sm:$0xff]  ;;  %v126_v12 = vld [vmem:[%s1192_s22 + $0x160] sm:$0xff] }
  0x23   : > { %v127_v13 = vld [vmem:[%s1192_s22 + $0x168] sm:$0xff]  ;;  %v128_v14 = vld [vmem:[%s1192_s22 + $0x170] sm:$0xff]  ;;  %v129_v17 = vld [vmem:[%s1192_s22 + $0x178] sm:$0xff] }
  0x24   : > { %v180_v15 = vld [vmem:[%s1208_s1 + $0x108] sm:$0xff]  ;;  %v181_v16 = vld [vmem:[%s1208_s1 + $0x110] sm:$0xff]  ;;  %v130_v18 = vld [vmem:[%s1192_s22 + $0x180] sm:$0xff] }
  0x25   : > { %v131_v19 = vld [vmem:[%s1192_s22 + $0x188] sm:$0xff]  ;;  %v182_v20 = vld [vmem:[%s1208_s1 + $0x118] sm:$0xff]  ;;  %v183_v21 = vld [vmem:[%s1208_s1 + $0x120] sm:$0xff]  ;;  %v1218_v23 = vsub.f32 %v115_v1, %v180_v15  ;;  %v1220_v24 = vsub.f32 %v116_v2, %v181_v16 }
  0x26   : > { %v184_v22 = vld [vmem:[%s1208_s1 + $0x128] sm:$0xff]  ;;  %v132_v25 = vld [vmem:[%s1192_s22 + $0x190] sm:$0xff]  ;;  %v133_v26 = vld [vmem:[%s1192_s22 + $0x198] sm:$0xff]  ;;  %v1228_v31 = vsub.f32 %v117_v3, %v182_v20  ;;  %v1230_v32 = vsub.f32 %v118_v4, %v183_v21 }
  0x27   : > { %v134_v27 = vld [vmem:[%s1192_s22 + $0x1a0] sm:$0xff]  ;;  %v185_v28 = vld [vmem:[%s1208_s1 + $0x130] sm:$0xff]  ;;  %v186_v29 = vld [vmem:[%s1208_s1 + $0x138] sm:$0xff]  ;;  %v1232_v33 = vsub.f32 %v119_v5, %v184_v22 }
  0x28   : > { %v187_v30 = vld [vmem:[%s1208_s1 + $0x140] sm:$0xff]  ;;  %v135_v34 = vld [vmem:[%s1192_s22 + $0x1a8] sm:$0xff]  ;;  %v136_v35 = vld [vmem:[%s1192_s22 + $0x1b0] sm:$0xff]  ;;  %v1240_v40 = vsub.f32 %v120_v6, %v185_v28  ;;  %v1242_v41 = vsub.f32 %v121_v7, %v186_v29 }
  0x29   : > { %v137_v36 = vld [vmem:[%s1192_s22 + $0x1b8] sm:$0xff]  ;;  %v188_v37 = vld [vmem:[%s1208_s1 + $0x148] sm:$0xff]  ;;  %v189_v38 = vld [vmem:[%s1208_s1 + $0x150] sm:$0xff]  ;;  %v1244_v42 = vsub.f32 %v122_v8, %v187_v30 }
  0x2a   : > { %v190_v39 = vld [vmem:[%s1208_s1 + $0x158] sm:$0xff]  ;;  %v138_v43 = vld [vmem:[%s1192_s22 + $0x1c0] sm:$0xff]  ;;  %v139_v44 = vld [vmem:[%s1192_s22 + $0x1c8] sm:$0xff]  ;;  %v1252_v49 = vsub.f32 %v123_v9, %v188_v37  ;;  %v1254_v50 = vsub.f32 %v124_v10, %v189_v38 }
  0x2b   : > { %v140_v45 = vld [vmem:[%s1192_s22 + $0x1d0] sm:$0xff]  ;;  %v191_v46 = vld [vmem:[%s1208_s1 + $0x160] sm:$0xff]  ;;  %v192_v47 = vld [vmem:[%s1208_s1 + $0x168] sm:$0xff]  ;;  %v1256_v51 = vsub.f32 %v125_v11, %v190_v39 }
  0x2c   : > { %v193_v48 = vld [vmem:[%s1208_s1 + $0x170] sm:$0xff]  ;;  %v141_v52 = vld [vmem:[%s1192_s22 + $0x1d8] sm:$0xff]  ;;  %v142_v53 = vld [vmem:[%s1192_s22 + $0x1e0] sm:$0xff]  ;;  %v1264_v58 = vsub.f32 %v126_v12, %v191_v46  ;;  %v1266_v59 = vsub.f32 %v127_v13, %v192_v47 }
  0x2d   : > { %v143_v54 = vld [vmem:[%s1192_s22 + $0x1e8] sm:$0xff]  ;;  %v194_v55 = vld [vmem:[%s1208_s1 + $0x178] sm:$0xff]  ;;  %v195_v56 = vld [vmem:[%s1208_s1 + $0x180] sm:$0xff]  ;;  %v1268_v60 = vsub.f32 %v128_v14, %v193_v48 }
  0x2e   : > { %v196_v57 = vld [vmem:[%s1208_s1 + $0x188] sm:$0xff]  ;;  %v144_v61 = vld [vmem:[%s1192_s22 + $0x1f0] sm:$0xff]  ;;  %v145_v62 = vld [vmem:[%s1192_s22 + $0x1f8] sm:$0xff]  ;;  %v1275_v3 = vsub.f32 %v129_v17, %v194_v55  ;;  %v1277_v4 = vsub.f32 %v130_v18, %v195_v56 }
  0x2f   : > { %v197_v63 = vld [vmem:[%s1208_s1 + $0x190] sm:$0xff]  ;;  %v198_v1 = vld [vmem:[%s1208_s1 + $0x198] sm:$0xff]  ;;  %v199_v2 = vld [vmem:[%s1208_s1 + $0x1a0] sm:$0xff]  ;;  %v1279_v5 = vsub.f32 %v131_v19, %v196_v57 }
  0x30   : > { %v200_v6 = vld [vmem:[%s1208_s1 + $0x1a8] sm:$0xff]  ;;  %v201_v7 = vld [vmem:[%s1208_s1 + $0x1b0] sm:$0xff]  ;;  %v202_v8 = vld [vmem:[%s1208_s1 + $0x1b8] sm:$0xff]  ;;  %v1284_v9 = vsub.f32 %v132_v25, %v197_v63  ;;  %v1286_v10 = vsub.f32 %v133_v26, %v198_v1  ;;  %v1288_v11 = vsub.f32 %v134_v27, %v199_v2 }
  0x31   : > { %v203_v12 = vld [vmem:[%s1208_s1 + $0x1c0] sm:$0xff]  ;;  %v204_v13 = vld [vmem:[%s1208_s1 + $0x1c8] sm:$0xff]  ;;  %v205_v14 = vld [vmem:[%s1208_s1 + $0x1d0] sm:$0xff]  ;;  %v1293_v15 = vsub.f32 %v135_v34, %v200_v6  ;;  %v1295_v16 = vsub.f32 %v136_v35, %v201_v7  ;;  %v1297_v17 = vsub.f32 %v137_v36, %v202_v8 }
  0x32   : > { %v206_v18 = vld [vmem:[%s1208_s1 + $0x1d8] sm:$0xff]  ;;  %v207_v19 = vld [vmem:[%s1208_s1 + $0x1e0] sm:$0xff]  ;;  %v208_v20 = vld [vmem:[%s1208_s1 + $0x1e8] sm:$0xff]  ;;  %v1302_v21 = vsub.f32 %v138_v43, %v203_v12  ;;  %v1304_v22 = vsub.f32 %v139_v44, %v204_v13  ;;  %v1306_v25 = vsub.f32 %v140_v45, %v205_v14 }
  0x33   : > { %v82_v26 = vld [vmem:[%s1192_s22] sm:$0xff]  ;;  %v209_v27 = vld [vmem:[%s1208_s1 + $0x1f0] sm:$0xff]  ;;  %v210_v28 = vld [vmem:[%s1208_s1 + $0x1f8] sm:$0xff]  ;;  %v1311_v29 = vsub.f32 %v141_v52, %v206_v18  ;;  %v1313_v30 = vsub.f32 %v142_v53, %v207_v19  ;;  %v1315_v34 = vsub.f32 %v143_v54, %v208_v20 }
  0x34   : > { %v83_v35 = vld [vmem:[%s1192_s22 + $0x8] sm:$0xff]  ;;  %v147_v36 = vld [vmem:[%s1208_s1] sm:$0xff]  ;;  %v1320_v38 = vsub.f32 %v144_v61, %v209_v27  ;;  %v1322_v39 = vsub.f32 %v145_v62, %v210_v28  ;;  %v84_v43 = vld [vmem:[%s1192_s22 + $0x10] sm:$0xff] }
  0x35   : > { %v148_v37 = vld [vmem:[%s1208_s1 + $0x8] sm:$0xff]  ;;  %v149_v44 = vld [vmem:[%s1208_s1 + $0x10] sm:$0xff]  ;;  %v211_v45 = vsub.f32 %v82_v26, %v147_v36  ;;  %v85_v47 = vld [vmem:[%s1192_s22 + $0x18] sm:$0xff] }
  0x36   : > { %v212_v46 = vsub.f32 %v83_v35, %v148_v37  ;;  %v150_v48 = vld [vmem:[%s1208_s1 + $0x18] sm:$0xff]  ;;  %v213_v52 = vsub.f32 %v84_v43, %v149_v44  ;;  %v86_v53 = vld [vmem:[%s1192_s22 + $0x20] sm:$0xff]  ;;  %v87_v61 = vld [vmem:[%s1192_s22 + $0x28] sm:$0xff] }
  0x37   : > { %v151_v54 = vld [vmem:[%s1208_s1 + $0x20] sm:$0xff]  ;;  %v214_v55 = vsub.f32 %v85_v47, %v150_v48  ;;  %v275_v56 = vmul.f32 %v211_v45, %v211_v45  ;;  %v152_v62 = vld [vmem:[%s1208_s1 + $0x28] sm:$0xff]  ;;  %v88_v2 = vld [vmem:[%s1192_s22 + $0x30] sm:$0xff] }
  0x38   : > { %v276_v57 = vmul.f32 %v212_v46, %v212_v46  ;;  %v215_v63 = vsub.f32 %v86_v53, %v151_v54  ;;  %v277_v1 = vmul.f32 %v213_v52, %v213_v52  ;;  %v153_v6 = vld [vmem:[%s1208_s1 + $0x30] sm:$0xff]  ;;  %v216_v7 = vsub.f32 %v87_v61, %v152_v62  ;;  %v89_v13 = vld [vmem:[%s1192_s22 + $0x38] sm:$0xff]  ;;  %v90_v26 = vld [vmem:[%s1192_s22 + $0x40] sm:$0xff] }
  0x39   : > { %v278_v8 = vmul.f32 %v214_v55, %v214_v55  ;;  %v154_v14 = vld [vmem:[%s1208_s1 + $0x38] sm:$0xff]  ;;  %v217_v18 = vsub.f32 %v88_v2, %v153_v6  ;;  %v155_v27 = vld [vmem:[%s1208_s1 + $0x40] sm:$0xff]  ;;  %v91_v37 = vld [vmem:[%s1192_s22 + $0x48] sm:$0xff] }
  0x3a   : > { %v339_v12 = vadd.f32 %v276_v57, %v275_v56  ;;  %v279_v19 = vmul.f32 %v215_v63, %v215_v63  ;;  %v218_v28 = vsub.f32 %v89_v13, %v154_v14  ;;  %v280_v35 = vmul.f32 %v216_v7, %v216_v7  ;;  %v156_v43 = vld [vmem:[%s1208_s1 + $0x48] sm:$0xff]  ;;  %v92_v47 = vld [vmem:[%s1192_s22 + $0x50] sm:$0xff]  ;;  %v93_v55 = vld [vmem:[%s1192_s22 + $0x58] sm:$0xff] }
  0x3b   : > { %v219_v44 = vsub.f32 %v90_v26, %v155_v27  ;;  %v281_v45 = vmul.f32 %v217_v18, %v217_v18  ;;  %v157_v48 = vld [vmem:[%s1208_s1 + $0x50] sm:$0xff]  ;;  %v220_v52 = vsub.f32 %v91_v37, %v156_v43  ;;  %v158_v56 = vld [vmem:[%s1208_s1 + $0x58] sm:$0xff]  ;;  %v94_v63 = vld [vmem:[%s1192_s22 + $0x60] sm:$0xff] }
  0x3c   : > { %v340_v20 = vadd.f32 %v339_v12, %v277_v1  ;;  %v282_v53 = vmul.f32 %v218_v28, %v218_v28  ;;  %v221_v57 = vsub.f32 %v92_v47, %v157_v48  ;;  %v159_v1 = vld [vmem:[%s1208_s1 + $0x60] sm:$0xff]  ;;  %v222_v2 = vsub.f32 %v93_v55, %v158_v56  ;;  %v160_v12 = vld [vmem:[%s1208_s1 + $0x68] sm:$0xff] }
  0x3d   : > { %v283_v61 = vmul.f32 %v219_v44, %v219_v44  ;;  %v284_v6 = vmul.f32 %v220_v52, %v220_v52  ;;  %v223_v13 = vsub.f32 %v94_v63, %v159_v1 }
  0x3e   : > { %v341_v36 = vadd.f32 %v340_v20, %v278_v8  ;;  %v95_v8 = vld [vmem:[%s1192_s22 + $0x68] sm:$0xff]  ;;  %v285_v14 = vmul.f32 %v221_v57, %v221_v57  ;;  %v161_v20 = vld [vmem:[%s1208_s1 + $0x70] sm:$0xff]  ;;  %v286_v27 = vmul.f32 %v222_v2, %v222_v2 }
  0x3f   : > { %v224_v26 = vsub.f32 %v95_v8, %v160_v12  ;;  %v287_v43 = vmul.f32 %v223_v13, %v223_v13 }
  0x40   : > { %v342_v46 = vadd.f32 %v341_v36, %v279_v19  ;;  %v96_v19 = vld [vmem:[%s1192_s22 + $0x70] sm:$0xff]  ;;  %v162_v36 = vld [vmem:[%s1208_s1 + $0x78] sm:$0xff] }
  0x41   : > { %v225_v37 = vsub.f32 %v96_v19, %v161_v20  ;;  %v288_v48 = vmul.f32 %v224_v26, %v224_v26 }
  0x42   : > { %v343_v54 = vadd.f32 %v342_v46, %v280_v35  ;;  %v97_v35 = vld [vmem:[%s1192_s22 + $0x78] sm:$0xff]  ;;  %v163_v46 = vld [vmem:[%s1208_s1 + $0x80] sm:$0xff] }
  0x43   : > { %v226_v47 = vsub.f32 %v97_v35, %v162_v36  ;;  %v289_v56 = vmul.f32 %v225_v37, %v225_v37 }
  0x44   : > { %v344_v62 = vadd.f32 %v343_v54, %v281_v45  ;;  %v98_v45 = vld [vmem:[%s1192_s22 + $0x80] sm:$0xff]  ;;  %v164_v54 = vld [vmem:[%s1208_s1 + $0x88] sm:$0xff] }
  0x45   : > { %v227_v55 = vsub.f32 %v98_v45, %v163_v46  ;;  %v290_v1 = vmul.f32 %v226_v47, %v226_v47 }
  0x46   : > { %v345_v7 = vadd.f32 %v344_v62, %v282_v53  ;;  %v99_v53 = vld [vmem:[%s1192_s22 + $0x88] sm:$0xff]  ;;  %v165_v62 = vld [vmem:[%s1208_s1 + $0x90] sm:$0xff] }
  0x47   : > { %v228_v63 = vsub.f32 %v99_v53, %v164_v54  ;;  %v291_v12 = vmul.f32 %v227_v55, %v227_v55 }
  0x48   : > { %v346_v18 = vadd.f32 %v345_v7, %v283_v61  ;;  %v100_v61 = vld [vmem:[%s1192_s22 + $0x90] sm:$0xff]  ;;  %v166_v7 = vld [vmem:[%s1208_s1 + $0x98] sm:$0xff] }
  0x49   : > { %v229_v8 = vsub.f32 %v100_v61, %v165_v62  ;;  %v292_v20 = vmul.f32 %v228_v63, %v228_v63 }
  0x4a   : > { %v347_v28 = vadd.f32 %v346_v18, %v284_v6  ;;  %v101_v6 = vld [vmem:[%s1192_s22 + $0x98] sm:$0xff]  ;;  %v167_v18 = vld [vmem:[%s1208_s1 + $0xa0] sm:$0xff] }
  0x4b   : > { %v230_v19 = vsub.f32 %v101_v6, %v166_v7  ;;  %v293_v36 = vmul.f32 %v229_v8, %v229_v8 }
  0x4c   : > { %v348_v44 = vadd.f32 %v347_v28, %v285_v14  ;;  %v102_v14 = vld [vmem:[%s1192_s22 + $0xa0] sm:$0xff]  ;;  %v168_v28 = vld [vmem:[%s1208_s1 + $0xa8] sm:$0xff] }
  0x4d   : > { %v231_v35 = vsub.f32 %v102_v14, %v167_v18  ;;  %v294_v46 = vmul.f32 %v230_v19, %v230_v19 }
  0x4e   : > { %v349_v52 = vadd.f32 %v348_v44, %v286_v27  ;;  %v103_v27 = vld [vmem:[%s1192_s22 + $0xa8] sm:$0xff]  ;;  %v169_v44 = vld [vmem:[%s1208_s1 + $0xb0] sm:$0xff] }
  0x4f   : > { %v232_v45 = vsub.f32 %v103_v27, %v168_v28  ;;  %v295_v54 = vmul.f32 %v231_v35, %v231_v35 }
  0x50   : > { %v350_v57 = vadd.f32 %v349_v52, %v287_v43  ;;  %v104_v43 = vld [vmem:[%s1192_s22 + $0xb0] sm:$0xff]  ;;  %v170_v52 = vld [vmem:[%s1208_s1 + $0xb8] sm:$0xff] }
  0x51   : > { %v233_v53 = vsub.f32 %v104_v43, %v169_v44  ;;  %v296_v62 = vmul.f32 %v232_v45, %v232_v45 }
  0x52   : > { %v351_v2 = vadd.f32 %v350_v57, %v288_v48  ;;  %v105_v48 = vld [vmem:[%s1192_s22 + $0xb8] sm:$0xff]  ;;  %v171_v57 = vld [vmem:[%s1208_s1 + $0xc0] sm:$0xff] }
  0x53   : > { %v234_v61 = vsub.f32 %v105_v48, %v170_v52  ;;  %v297_v7 = vmul.f32 %v233_v53, %v233_v53 }
  0x54   : > { %v352_v13 = vadd.f32 %v351_v2, %v289_v56  ;;  %v106_v56 = vld [vmem:[%s1192_s22 + $0xc0] sm:$0xff]  ;;  %v172_v2 = vld [vmem:[%s1208_s1 + $0xc8] sm:$0xff] }
  0x55   : > { %v235_v6 = vsub.f32 %v106_v56, %v171_v57  ;;  %v298_v18 = vmul.f32 %v234_v61, %v234_v61 }
  0x56   : > { %v353_v26 = vadd.f32 %v352_v13, %v290_v1  ;;  %v107_v1 = vld [vmem:[%s1192_s22 + $0xc8] sm:$0xff]  ;;  %v173_v13 = vld [vmem:[%s1208_s1 + $0xd0] sm:$0xff] }
  0x57   : > { %v236_v14 = vsub.f32 %v107_v1, %v172_v2  ;;  %v299_v28 = vmul.f32 %v235_v6, %v235_v6 }
  0x58   : > { %v354_v37 = vadd.f32 %v353_v26, %v291_v12  ;;  %v108_v12 = vld [vmem:[%s1192_s22 + $0xd0] sm:$0xff]  ;;  %v174_v26 = vld [vmem:[%s1208_s1 + $0xd8] sm:$0xff] }
  0x59   : > { %v237_v27 = vsub.f32 %v108_v12, %v173_v13  ;;  %v300_v44 = vmul.f32 %v236_v14, %v236_v14 }
  0x5a   : > { %v355_v47 = vadd.f32 %v354_v37, %v292_v20  ;;  %v109_v20 = vld [vmem:[%s1192_s22 + $0xd8] sm:$0xff]  ;;  %v175_v37 = vld [vmem:[%s1208_s1 + $0xe0] sm:$0xff] }
  0x5b   : > { %v238_v43 = vsub.f32 %v109_v20, %v174_v26  ;;  %v301_v52 = vmul.f32 %v237_v27, %v237_v27 }
  0x5c   : > { %v356_v55 = vadd.f32 %v355_v47, %v293_v36  ;;  %v110_v36 = vld [vmem:[%s1192_s22 + $0xe0] sm:$0xff]  ;;  %v176_v47 = vld [vmem:[%s1208_s1 + $0xe8] sm:$0xff] }
  0x5d   : > { %v239_v48 = vsub.f32 %v110_v36, %v175_v37  ;;  %v302_v57 = vmul.f32 %v238_v43, %v238_v43  ;;  %v308_v36 = vmul.f32 %v1218_v23, %v1218_v23  ;;  %v309_v43 = vmul.f32 %v1220_v24, %v1220_v24 }
  0x5e   : > { %v357_v63 = vadd.f32 %v356_v55, %v294_v46  ;;  %v111_v46 = vld [vmem:[%s1192_s22 + $0xe8] sm:$0xff]  ;;  %v177_v55 = vld [vmem:[%s1208_s1 + $0xf0] sm:$0xff]  ;;  %v313_v23 = vmul.f32 %v1240_v40, %v1240_v40  ;;  %v314_v24 = vmul.f32 %v1242_v41, %v1242_v41  ;;  %v318_v40 = vmul.f32 %v1256_v51, %v1256_v51 }
  0x5f   : > { %v240_v56 = vsub.f32 %v111_v46, %v176_v47  ;;  %v303_v2 = vmul.f32 %v239_v48, %v239_v48  ;;  %v311_v47 = vmul.f32 %v1230_v32, %v1230_v32  ;;  %v316_v32 = vmul.f32 %v1252_v49, %v1252_v49 }
  0x60   : > { %v358_v8 = vadd.f32 %v357_v63, %v295_v54  ;;  %v112_v54 = vld [vmem:[%s1192_s22 + $0xf0] sm:$0xff]  ;;  %v178_v63 = vld [vmem:[%s1208_s1 + $0xf8] sm:$0xff]  ;;  %v319_v41 = vmul.f32 %v1264_v58, %v1264_v58  ;;  %v321_v49 = vmul.f32 %v1268_v60, %v1268_v60  ;;  %v323_v51 = vmul.f32 %v1277_v4, %v1277_v4 }
  0x61   : > { %v241_v1 = vsub.f32 %v112_v54, %v177_v55  ;;  %v304_v13 = vmul.f32 %v240_v56, %v240_v56  ;;  %v324_v58 = vmul.f32 %v1279_v5, %v1279_v5  ;;  %v326_v60 = vmul.f32 %v1286_v10, %v1286_v10 }
  0x62   : > { %v359_v19 = vadd.f32 %v358_v8, %v296_v62  ;;  %v113_v62 = vld [vmem:[%s1192_s22 + $0xf8] sm:$0xff]  ;;  %v179_v8 = vld [vmem:[%s1208_s1 + $0x100] sm:$0xff]  ;;  %v328_v4 = vmul.f32 %v1293_v15, %v1293_v15  ;;  %v329_v5 = vmul.f32 %v1295_v16, %v1295_v16  ;;  %v331_v10 = vmul.f32 %v1302_v21, %v1302_v21 }
  0x63   : > { %v242_v12 = vsub.f32 %v113_v62, %v178_v63  ;;  %v333_v15 = vmul.f32 %v1306_v25, %v1306_v25  ;;  %v334_v16 = vmul.f32 %v1311_v29, %v1311_v29  ;;  %v336_v21 = vmul.f32 %v1315_v34, %v1315_v34 }
  0x64   : > { %v360_v35 = vadd.f32 %v359_v19, %v297_v7  ;;  %v114_v7 = vld [vmem:[%s1192_s22 + $0x100] sm:$0xff]  ;;  %v305_v19 = vmul.f32 %v241_v1, %v241_v1  ;;  %v338_v25 = vmul.f32 %v1322_v39, %v1322_v39 }
  0x65   : > { %v306_v26 = vmul.f32 %v242_v12, %v242_v12 }
  0x66   : > { %v361_v45 = vadd.f32 %v360_v35, %v298_v18  ;;  %v243_v18 = vsub.f32 %v114_v7, %v179_v8 }
  0x68   : > { %v362_v53 = vadd.f32 %v361_v45, %v299_v28  ;;  %v307_v28 = vmul.f32 %v243_v18, %v243_v18  ;;  %v310_v45 = vmul.f32 %v1228_v31, %v1228_v31  ;;  %v315_v31 = vmul.f32 %v1244_v42, %v1244_v42 }
  0x69   : > { %v320_v42 = vmul.f32 %v1266_v59, %v1266_v59  ;;  %v325_v59 = vmul.f32 %v1284_v9, %v1284_v9  ;;  %v330_v9 = vmul.f32 %v1297_v17, %v1297_v17  ;;  %v335_v17 = vmul.f32 %v1313_v30, %v1313_v30 }
  0x6a   : > { %v363_v61 = vadd.f32 %v362_v53, %v300_v44 }
  0x6c   : > { %v364_v6 = vadd.f32 %v363_v61, %v301_v52  ;;  %v312_v52 = vmul.f32 %v1232_v33, %v1232_v33  ;;  %v317_v33 = vmul.f32 %v1254_v50, %v1254_v50  ;;  %v322_v50 = vmul.f32 %v1275_v3, %v1275_v3 }
  0x6d   : > { %v327_v3 = vmul.f32 %v1288_v11, %v1288_v11  ;;  %v332_v11 = vmul.f32 %v1304_v22, %v1304_v22  ;;  %v337_v22 = vmul.f32 %v1320_v38, %v1320_v38 }
  0x6e   : > { %v365_v14 = vadd.f32 %v364_v6, %v302_v57 }
  0x70   : > { %v366_v20 = vadd.f32 %v365_v14, %v303_v2 }
  0x72   : > { %v367_v27 = vadd.f32 %v366_v20, %v304_v13 }
  0x74   : > { %v368_v35 = vadd.f32 %v367_v27, %v305_v19 }
  0x76   : > { %v369_v37 = vadd.f32 %v368_v35, %v306_v26 }
  0x78   : > { %v370_v44 = vadd.f32 %v369_v37, %v307_v28 }
  0x7a   : > { %v371_v46 = vadd.f32 %v370_v44, %v308_v36 }
  0x7c   : > { %v372_v48 = vadd.f32 %v371_v46, %v309_v43 }
  0x7e   : > { %v373_v53 = vadd.f32 %v372_v48, %v310_v45 }
  0x80   : > { %v374_v54 = vadd.f32 %v373_v53, %v311_v47 }
  0x82   : > { %v375_v55 = vadd.f32 %v374_v54, %v312_v52 }
  0x84   : > { %v376_v56 = vadd.f32 %v375_v55, %v313_v23 }
  0x86   : > { %v377_v57 = vadd.f32 %v376_v56, %v314_v24 }
  0x88   : > { %v378_v61 = vadd.f32 %v377_v57, %v315_v31 }
  0x8a   : > { %v379_v62 = vadd.f32 %v378_v61, %v316_v32 }
  0x8c   : > { %v380_v63 = vadd.f32 %v379_v62, %v317_v33 }
  0x8e   : > { %v381_v1 = vadd.f32 %v380_v63, %v318_v40 }
  0x90   : > { %v382_v2 = vadd.f32 %v381_v1, %v319_v41 }
  0x92   : > { %v383_v6 = vadd.f32 %v382_v2, %v320_v42 }
  0x94   : > { %v384_v7 = vadd.f32 %v383_v6, %v321_v49 }
  0x96   : > { %v385_v8 = vadd.f32 %v384_v7, %v322_v50 }
  0x98   : > { %v386_v12 = vadd.f32 %v385_v8, %v323_v51 }
  0x9a   : > { %v387_v13 = vadd.f32 %v386_v12, %v324_v58 }
  0x9c   : > { %v388_v14 = vadd.f32 %v387_v13, %v325_v59 }
  0x9e   : > { %v389_v18 = vadd.f32 %v388_v14, %v326_v60 }
  0xa0   : > { %v390_v19 = vadd.f32 %v389_v18, %v327_v3 }
  0xa2   : > { %v391_v20 = vadd.f32 %v390_v19, %v328_v4 }
  0xa4   : > { %v392_v26 = vadd.f32 %v391_v20, %v329_v5 }
  0xa6   : > { %v393_v27 = vadd.f32 %v392_v26, %v330_v9 }
  0xa8   : > { %v394_v28 = vadd.f32 %v393_v27, %v331_v10 }
  0xaa   : > { %v395_v35 = vadd.f32 %v394_v28, %v332_v11 }
  0xac   : > { %v396_v36 = vadd.f32 %v395_v35, %v333_v15 }
  0xae   : > { %v397_v37 = vadd.f32 %v396_v36, %v334_v16 }
  0xb0   : > { %v398_v43 = vadd.f32 %v397_v37, %v335_v17 }
  0xb2   : > { %v399_v44 = vadd.f32 %v398_v43, %v336_v21 }
  0xb4   : > { %v400_v45 = vadd.f32 %v399_v44, %v337_v22 }
  0xb6   : > { %v401_v46 = vadd.f32 %v400_v45, %v338_v25  ;;  %77 = sbr.rel (!%p75_p10) target bundleno = 29 (0x1d), region = 73 }
  0xb8   : > { %v402_v29 = vadd.f32 %v1149_v0, %v401_v46  }
  0xba   : > { %v1460_v0 = vmov %v402_v29  ;;  %1005 = vadd.xlane.f32.xlu0 (%p75_p10), %v402_v29 }
 0x143   :  { %v1006_v30 = vpop.xlane.xlu0 %1005 }
 0x144   :  { %v1007_v34 = vrot.slane %v1006_v30, 4 }
 0x146   :  { %v1008_v38 = vadd.f32 %v1007_v34, %v1006_v30 }
 0x148   :  { %v1009_v47 = vrot.slane %v1008_v38, 2 }
 0x14a   :  { %v1010_v48 = vadd.f32 %v1009_v47, %v1008_v38 }
 0x14c   :  { %v1011_v39 = vrot.slane %v1010_v48, 1 }
 0x14e   :  { %v1012_v52 = vadd.f32 %v1011_v39, %v1010_v48 }
 0x150   :  { %1061 = vpush %v1012_v52 }
 0x181   :  { %s1062_s23 = spop %1061 }
 0x182   :  { %1015 = sst [smem:[#allocation8]] %s1062_s23 }
 0x183   :  { %1023 = dma.smem_to_hbm %s1159_s24, 16, %s1459_s2, [#allocation5]  }
 0x184   :  { %1145 = dma.done.wait [#allocation5], 16  }
 0x185   :  { %1146 = vsyncadd [#allocation5], 4294967280 }
 0x186   :  { %1027 = sfence }
 0x187   :  { %1028 = vsyncpa [#allocation4], 1 }
 0x188   :  { %1029 = vsyncpa [#allocation7], 1 }
 0x189   :  { %1030 = vsyncpa [#allocation5], 1 }

</bundles_post_ra>
